<compile_context>
chip_gen: v5e
topology: v5e:2x2
jax: 0.10.0
libtpu: 0.0.40
codegen_flags: <defaults>
</compile_context>

<pallas_src>
import functools

import jax
import jax.numpy as jnp
from jax import lax
from jax.experimental import pallas as pl
from jax.experimental.pallas import tpu as pltpu

HIDDEN = 256
B_TILE_MAX = 256  # fills the MXU M dim on v6e/v7x; multiple of 16 for bf16 packing


def _round_up(n, m):
    return ((n + m - 1) // m) * m


def _critic_kernel(xa_ref, w1_ref, b1_ref, w2_ref, b2_ref, w3t_ref, b3_ref,
                   out_ref):
    # xa_ref : (BT, d_in)     bf16   concat(obs, act) rows for this batch tile
    # w1_ref : (d_in, 256)    bf16   b1_ref: (1, 256) f32
    # w2_ref : (256, 256)     bf16   b2_ref: (1, 256) f32
    # w3t_ref: (1, 256)       bf16   (output weight, transposed)
    # b3_ref : (1, 1)         f32
    # out_ref: (1, BT)        f32    lane-dense: batch on the lane axis
    h = jnp.dot(xa_ref[...], w1_ref[...], preferred_element_type=jnp.float32)
    h = jnp.maximum(h + b1_ref[...], 0.0)

    h = jnp.dot(h.astype(jnp.bfloat16), w2_ref[...],
                preferred_element_type=jnp.float32)
    h = jnp.maximum(h + b2_ref[...], 0.0)

    # Final layer as (1,256) . (BT,256)^T -> (1, BT): output is lane-dense.
    q = lax.dot_general(w3t_ref[...], h.astype(jnp.bfloat16),
                        dimension_numbers=(((1,), (1,)), ((), ())),
                        preferred_element_type=jnp.float32)
    out_ref[...] = q + b3_ref[...]


def prepare_params(params):
    """One-time (outside the hot path) cast / reshape of PyTorch-style params."""
    w1, b1, w2, b2, w3, b3 = params
    return (
        w1.astype(jnp.bfloat16),                       # (d_in, 256)
        b1.reshape(1, HIDDEN).astype(jnp.float32),     # (1, 256)
        w2.astype(jnp.bfloat16),                       # (256, 256)
        b2.reshape(1, HIDDEN).astype(jnp.float32),     # (1, 256)
        w3.T.reshape(1, HIDDEN).astype(jnp.bfloat16),  # (1, 256)
        b3.reshape(1, 1).astype(jnp.float32),          # (1, 1)
    )


@functools.partial(jax.jit, static_argnames=())
def critic_forward(x, a, prepared):
    """x: (B, n_obs), a: (B, n_act) -> (B,) critic values."""
    w1, b1, w2, b2, w3t, b3 = prepared
    B = x.shape[0]
    d_in = x.shape[-1] + a.shape[-1]

    # Batch tiling: full 256-row MXU tiles for large batches; for small batches
    # a single full-extent block rounded to the bf16 sublane pack (16).
    bt = min(B_TILE_MAX, _round_up(B, 16))
    bp = _round_up(B, bt)
    grid = (bp // bt,)

    xa = jnp.concatenate([x.astype(jnp.bfloat16), a.astype(jnp.bfloat16)],
                         axis=-1)                       # (B, d_in) bf16
    if bp != B:
        xa = jnp.pad(xa, ((0, bp - B), (0, 0)))         # pad batch rows only

    weight_bytes = (d_in * HIDDEN + HIDDEN * HIDDEN + HIDDEN) * 2 \
        + 2 * HIDDEN * 4 + 4
    cost = pl.CostEstimate(
        flops=2 * bp * (d_in * HIDDEN + HIDDEN * HIDDEN + HIDDEN),
        transcendentals=0,
        bytes_accessed=bp * d_in * 2 + weight_bytes + bp * 4,
    )

    out = pl.pallas_call(
        _critic_kernel,
        out_shape=jax.ShapeDtypeStruct((1, bp), jnp.float32),
        grid=grid,
        in_specs=[
            pl.BlockSpec((bt, d_in), lambda i: (i, 0)),       # xa: tiled over batch
            pl.BlockSpec((d_in, HIDDEN), lambda i: (0, 0)),   # w1: resident
            pl.BlockSpec((1, HIDDEN), lambda i: (0, 0)),      # b1
            pl.BlockSpec((HIDDEN, HIDDEN), lambda i: (0, 0)), # w2: resident
            pl.BlockSpec((1, HIDDEN), lambda i: (0, 0)),      # b2
            pl.BlockSpec((1, HIDDEN), lambda i: (0, 0)),      # w3^T
            pl.BlockSpec((1, 1), lambda i: (0, 0)),           # b3
        ],
        out_specs=pl.BlockSpec((1, bt), lambda i: (0, i)),    # lane-dense output
        compiler_params=pltpu.CompilerParams(
            dimension_semantics=("parallel",)),
        cost_estimate=cost,
    )(xa, w1, b1, w2, b2, w3t, b3)

    # (1, bp) -> (B,)  (squeeze like the PyTorch module, drop batch padding)
    return out[0, :B]


def init_params(key, n_observations, n_actions):
    """Deterministic init matching the nn.Linear shapes (PyTorch-style uniform)."""
    d_in = n_observations + n_actions
    ks = jax.random.split(key, 6)

    def uni(k, shape, fan_in):
        bound = 1.0 / jnp.sqrt(float(fan_in))
        return jax.random.uniform(k, shape, jnp.float32, -bound, bound)

    w1 = uni(ks[0], (d_in, HIDDEN), d_in)
    b1 = uni(ks[1], (HIDDEN,), d_in)
    w2 = uni(ks[2], (HIDDEN, HIDDEN), HIDDEN)
    b2 = uni(ks[3], (HIDDEN,), HIDDEN)
    w3 = uni(ks[4], (HIDDEN, 1), HIDDEN)
    b3 = uni(ks[5], (1,), HIDDEN)
    return (w1, b1, w2, b2, w3, b3)


def reference_forward(x, a, params):
    """Pure-JAX f32 reference for correctness check."""
    w1, b1, w2, b2, w3, b3 = params
    d = jnp.concatenate([x, a], axis=-1)
    d = jax.nn.relu(d @ w1 + b1)
    d = jax.nn.relu(d @ w2 + b2)
    d = d @ w3 + b3
    return jnp.squeeze(d, axis=-1)


if __name__ == "__main__":
    # Hopper-v2: n_observations = 11, n_actions = 3
    n_observations, n_actions, batch = 11, 3, 8

    key = jax.random.PRNGKey(0)
    k_x, k_a, k_p = jax.random.split(key, 3)

    x = jax.random.normal(k_x, (batch, n_observations), jnp.float32)
    a = jax.random.normal(k_a, (batch, n_actions), jnp.float32)
    params = init_params(k_p, n_observations, n_actions)
    prepared = prepare_params(params)   # one-time cast/transpose, not per-call

    out = critic_forward(x, a, prepared)
    out = jax.block_until_ready(out)

    ref = reference_forward(x, a, params)
    assert out.shape == (batch,), out.shape
    # bf16 matmul operands (f32 accumulation) -> loosened tolerance.
    assert jnp.allclose(out, ref, atol=2e-2, rtol=2e-2), (out, ref)

    print("KERNEL_OK")
</pallas_src>

<mosaic_0001>
module attributes {stable_mosaic.version = 11 : i64} {
  func.func @_critic_kernel(%arg0: i32, %arg1: memref<16x14xbf16, #tpu.memory_space<vmem>>, %arg2: memref<14x256xbf16, #tpu.memory_space<vmem>>, %arg3: memref<1x256xf32, #tpu.memory_space<vmem>>, %arg4: memref<256x256xbf16, #tpu.memory_space<vmem>>, %arg5: memref<1x256xf32, #tpu.memory_space<vmem>>, %arg6: memref<1x256xbf16, #tpu.memory_space<vmem>>, %arg7: memref<1x1xf32, #tpu.memory_space<vmem>>, %arg8: memref<1x16xf32, #tpu.memory_space<vmem>>) attributes {dimension_semantics = [#tpu.dimension_semantics<parallel>], iteration_bounds = array<i64: 1>, scalar_prefetch = 0 : i64, scratch_operands = 0 : i64, tpu.core_type = #tpu.core_type<tc>, window_params = [{transform_indices = @transform_0, window_bounds = array<i64: 16, 14>}, {pipeline_mode = #tpu.pipeline_mode<synchronous>, transform_indices = @transform_1, window_bounds = array<i64: 14, 256>}, {pipeline_mode = #tpu.pipeline_mode<synchronous>, transform_indices = @transform_2, window_bounds = array<i64: 1, 256>}, {pipeline_mode = #tpu.pipeline_mode<synchronous>, transform_indices = @transform_3, window_bounds = array<i64: 256, 256>}, {pipeline_mode = #tpu.pipeline_mode<synchronous>, transform_indices = @transform_4, window_bounds = array<i64: 1, 256>}, {pipeline_mode = #tpu.pipeline_mode<synchronous>, transform_indices = @transform_5, window_bounds = array<i64: 1, 256>}, {pipeline_mode = #tpu.pipeline_mode<synchronous>, transform_indices = @transform_6, window_bounds = array<i64: 1, 1>}, {transform_indices = @transform_7, window_bounds = array<i64: 1, 16>}]} {
    %c0 = arith.constant 0 : index
    %c0_0 = arith.constant 0 : index
    %0 = vector.load %arg1[%c0, %c0_0] : memref<16x14xbf16, #tpu.memory_space<vmem>>, vector<16x14xbf16>
    %c0_1 = arith.constant 0 : index
    %c0_2 = arith.constant 0 : index
    %1 = vector.load %arg2[%c0_1, %c0_2] : memref<14x256xbf16, #tpu.memory_space<vmem>>, vector<14x256xbf16>
    %cst = arith.constant dense<0.000000e+00> : vector<16x256xf32>
    %2 = tpu.matmul %0, %1, %cst {dimension_numbers = #tpu.dot_dimension_numbers<[1], [0], [0], [1], [0, 0, 1, 1], [], []>} : vector<16x14xbf16>, vector<14x256xbf16>, vector<16x256xf32> -> vector<16x256xf32>
    %c0_3 = arith.constant 0 : index
    %c0_4 = arith.constant 0 : index
    %3 = vector.load %arg3[%c0_3, %c0_4] : memref<1x256xf32, #tpu.memory_space<vmem>>, vector<1x256xf32>
    %4 = vector.broadcast %3 : vector<1x256xf32> to vector<16x256xf32>
    %5 = arith.addf %2, %4 : vector<16x256xf32>
    %cst_5 = arith.constant 0.000000e+00 : f32
    %6 = vector.broadcast %cst_5 : f32 to vector<16x256xf32>
    %7 = arith.maximumf %5, %6 : vector<16x256xf32>
    %8 = arith.truncf %7 : vector<16x256xf32> to vector<16x256xbf16>
    %c0_6 = arith.constant 0 : index
    %c0_7 = arith.constant 0 : index
    %9 = vector.load %arg4[%c0_6, %c0_7] : memref<256x256xbf16, #tpu.memory_space<vmem>>, vector<256x256xbf16>
    %cst_8 = arith.constant dense<0.000000e+00> : vector<16x256xf32>
    %10 = tpu.matmul %8, %9, %cst_8 {dimension_numbers = #tpu.dot_dimension_numbers<[1], [0], [0], [1], [0, 0, 1, 1], [], []>} : vector<16x256xbf16>, vector<256x256xbf16>, vector<16x256xf32> -> vector<16x256xf32>
    %c0_9 = arith.constant 0 : index
    %c0_10 = arith.constant 0 : index
    %11 = vector.load %arg5[%c0_9, %c0_10] : memref<1x256xf32, #tpu.memory_space<vmem>>, vector<1x256xf32>
    %12 = vector.broadcast %11 : vector<1x256xf32> to vector<16x256xf32>
    %13 = arith.addf %10, %12 : vector<16x256xf32>
    %cst_11 = arith.constant 0.000000e+00 : f32
    %14 = vector.broadcast %cst_11 : f32 to vector<16x256xf32>
    %15 = arith.maximumf %13, %14 : vector<16x256xf32>
    %c0_12 = arith.constant 0 : index
    %c0_13 = arith.constant 0 : index
    %16 = vector.load %arg6[%c0_12, %c0_13] : memref<1x256xbf16, #tpu.memory_space<vmem>>, vector<1x256xbf16>
    %17 = arith.truncf %15 : vector<16x256xf32> to vector<16x256xbf16>
    %cst_14 = arith.constant dense<0.000000e+00> : vector<1x16xf32>
    %18 = tpu.matmul %16, %17, %cst_14 {dimension_numbers = #tpu.dot_dimension_numbers<[1], [1], [0], [0], [0, 0, 1, 0], [], []>} : vector<1x256xbf16>, vector<16x256xbf16>, vector<1x16xf32> -> vector<1x16xf32>
    %c0_15 = arith.constant 0 : index
    %c0_16 = arith.constant 0 : index
    %19 = vector.load %arg7[%c0_15, %c0_16] : memref<1x1xf32, #tpu.memory_space<vmem>>, vector<1x1xf32>
    %20 = vector.broadcast %19 : vector<1x1xf32> to vector<1x16xf32>
    %21 = arith.addf %18, %20 : vector<1x16xf32>
    %c0_17 = arith.constant 0 : index
    %c0_18 = arith.constant 0 : index
    %22 = vector.load %arg8[%c0_17, %c0_18] : memref<1x16xf32, #tpu.memory_space<vmem>>, vector<1x16xf32>
    tpu.vector_store %arg8[%c0_17, %c0_18], %21 {strides = array<i32>} : memref<1x16xf32, #tpu.memory_space<vmem>>, vector<1x16xf32>,
    return
  }
  func.func @transform_0(%arg0: i32) -> (i32, i32) {
    %c0_i32 = arith.constant 0 : i32
    %c0_i32_0 = arith.constant 0 : i32
    return %arg0, %c0_i32 : i32, i32
  }
  func.func @transform_1(%arg0: i32) -> (i32, i32) {
    %c0_i32 = arith.constant 0 : i32
    %c0_i32_0 = arith.constant 0 : i32
    %c0_i32_1 = arith.constant 0 : i32
    return %c0_i32, %c0_i32_0 : i32, i32
  }
  func.func @transform_2(%arg0: i32) -> (i32, i32) {
    %c0_i32 = arith.constant 0 : i32
    %c0_i32_0 = arith.constant 0 : i32
    %c0_i32_1 = arith.constant 0 : i32
    return %c0_i32, %c0_i32_0 : i32, i32
  }
  func.func @transform_3(%arg0: i32) -> (i32, i32) {
    %c0_i32 = arith.constant 0 : i32
    %c0_i32_0 = arith.constant 0 : i32
    %c0_i32_1 = arith.constant 0 : i32
    return %c0_i32, %c0_i32_0 : i32, i32
  }
  func.func @transform_4(%arg0: i32) -> (i32, i32) {
    %c0_i32 = arith.constant 0 : i32
    %c0_i32_0 = arith.constant 0 : i32
    %c0_i32_1 = arith.constant 0 : i32
    return %c0_i32, %c0_i32_0 : i32, i32
  }
  func.func @transform_5(%arg0: i32) -> (i32, i32) {
    %c0_i32 = arith.constant 0 : i32
    %c0_i32_0 = arith.constant 0 : i32
    %c0_i32_1 = arith.constant 0 : i32
    return %c0_i32, %c0_i32_0 : i32, i32
  }
  func.func @transform_6(%arg0: i32) -> (i32, i32) {
    %c0_i32 = arith.constant 0 : i32
    %c0_i32_0 = arith.constant 0 : i32
    %c0_i32_1 = arith.constant 0 : i32
    return %c0_i32, %c0_i32_0 : i32, i32
  }
  func.func @transform_7(%arg0: i32) -> (i32, i32) {
    %c0_i32 = arith.constant 0 : i32
    %c0_i32_0 = arith.constant 0 : i32
    return %c0_i32, %arg0 : i32, i32
  }
}

</mosaic_0001>

<bundles_post_ra>
// kernel: critic_forward.1
= control target key start
LH: loop header
LB: loop body
LE: loop exit
PB: predicated region body
PF: predicated region fallthrough
CT: control target
= control target key end

     0   :  { %s709_s0 = inlined_call_operand.vmem [shape: bf16[16,14], index: 0, kind: input, shape index: {}]   ;;  %s710_s1 = inlined_call_operand.vmem [shape: bf16[14,256], index: 1, kind: input, shape index: {}]   ;;  %s711_s2 = inlined_call_operand.vmem [shape: f32[1,256], index: 2, kind: input, shape index: {}]   ;;  %s712_s3 = inlined_call_operand.hbm [shape: bf16[256,256], index: 3, kind: input, shape index: {}]   ;;  %s713_s4 = inlined_call_operand.vmem [shape: f32[1,256], index: 4, kind: input, shape index: {}]   ;;  %s714_s5 = inlined_call_operand.vmem [shape: bf16[1,256], index: 5, kind: input, shape index: {}]   ;;  %s715_s6 = inlined_call_operand.<no memory space> [shape: f32[1,1], index: 6, kind: input, shape index: {}]   ;;  %s716_s7 = inlined_call_operand.vmem [shape: f32[1,16], index: 7, kind: output, shape index: {}]  }
   0x1   :  { %v12_v0 = vstv %s715_s6 }
   0x2   :  { %13 = vst [vmem:[#allocation2] sm:$0x1] %v12_v0 }
   0x3   :  { %14 = vsyncpa [#allocation4], 0  ;;  %s25_s28 = sshll.u32 %s712_s3, 4  ;;  %s628_s29 = smov [#allocation3]   ;;  %s26_s28 = int_to_ptr.hbm [resolvable:$true] %s25_s28 }
   0x4   :  { %s27_s30 = sshll.u32 %s628_s29, 4  ;;  %s629_s8 = smov 128   ;;  %s28_s30 = int_to_ptr.vmem [resolvable:$true] %s27_s30 }
   0x5   :  { %s630_s9 = smov 8  }
   0x6   :  { %33 = dma.hbm_to_vmem [thread:$0]  %s26_s28, 4096, %s28_s30, [#allocation4], %s629_s8, %s629_s8, %s630_s9  }
   0x7   :  { %626 = dma.done.wait [#allocation4], 4096  }
   0x8   :  { %627 = vsyncadd [#allocation4], 4294963200  ;;  %vm72_vm0 = vcmask 1046528   ;;  %v426_v1 = vld [vmem:[%s710_s1] sm:$0xf]  ;;  %vm68_vm1 = vcmask 113664  }
   0x9   :  { %v564_v2 = vld [vmem:[%s710_s1 + $0x4] sm:$0x70]  ;;  %v563_v3 = vld [vmem:[%s710_s1 + $0x4] sm:$0xf]  ;;  %v428_v5 = vld [vmem:[%s710_s1 + $0x8] sm:$0x70] }
   0xa   :  { %v427_v4 = vor.u32 %v564_v2, %v426_v1  ;;  %v492_v6 = vld [vmem:[#allocation3 + $0x70] sm:$0xf]  ;;  %v431_v7 = vor.u32 %v563_v3, %v428_v5  ;;  %v580_v8 = vld [vmem:[#allocation3 + $0x74] sm:$0xf0]  ;;  %v579_v15 = vld [vmem:[#allocation3 + $0x74] sm:$0xf] }
   0xb   :  { %v556_v9 = vld [vmem:[#allocation3 + $0xf0] sm:$0xf]  ;;  %v596_v10 = vld [vmem:[#allocation3 + $0xf4] sm:$0xf0]  ;;  %v493_v13 = vor.u32 %v580_v8, %v492_v6  ;;  %v494_v16 = vld [vmem:[#allocation3 + $0x78] sm:$0xf0] }
   0xc   :  { %v74_v11 = vsel %vm72_vm0, %v427_v4, 0  ;;  %v562_v12 = vld [vmem:[%s709_s0] sm:$0xff]  ;;  %v557_v14 = vor.u32 %v596_v10, %v556_v9  ;;  %v77_v17 = vsel %vm72_vm0, %v431_v7, 0  ;;  %v497_v18 = vor.u32 %v579_v15, %v494_v16  ;;  %v484_v22 = vld [vmem:[#allocation3 + $0x60] sm:$0xf] }
   0xd   :  { %86 = vmatpush.bf16.msra.mxu0 %v74_v11  ;;  %v595_v19 = vld [vmem:[#allocation3 + $0xf4] sm:$0xf]  ;;  %v558_v20 = vld [vmem:[#allocation3 + $0xf8] sm:$0xf0]  ;;  %100 = vmatpush.bf16.msra.mxu1 %v77_v17  ;;  %v578_v23 = vld [vmem:[#allocation3 + $0x64] sm:$0xf0] }
   0xe   :  { %311 = vmatpush.bf16.msra.mxu2 %v493_v13  ;;  %v561_v21 = vor.u32 %v595_v19, %v558_v20  ;;  %v548_v24 = vld [vmem:[#allocation3 + $0xe0] sm:$0xf]  ;;  %325 = vmatpush.bf16.msra.mxu3 %v557_v14  ;;  %v485_v25 = vor.u32 %v578_v23, %v484_v22  ;;  %v594_v26 = vld [vmem:[#allocation3 + $0xe4] sm:$0xf0]  ;;  %v577_v27 = vld [vmem:[#allocation3 + $0x64] sm:$0xf] }
   0xf   :  { %v486_v28 = vld [vmem:[#allocation3 + $0x68] sm:$0xf0]  ;;  %v549_v29 = vor.u32 %v594_v26, %v548_v24  ;;  %v593_v31 = vld [vmem:[#allocation3 + $0xe4] sm:$0xf]  ;;  %v476_v33 = vld [vmem:[#allocation3 + $0x50] sm:$0xf] }
  0x10   :  { %432 = vmatmul.msk.bf16.vlgmr.msra.gmra.mxu0 %vm68_vm1, %v562_v12  ;;  %v489_v30 = vor.u32 %v577_v27, %v486_v28  ;;  %v550_v32 = vld [vmem:[#allocation3 + $0xe8] sm:$0xf0]  ;;  %433 = vmatmul.msk.bf16.vlgmr.msra.gmra.mxu1 %vm68_vm1, %v562_v12  ;;  %v576_v35 = vld [vmem:[#allocation3 + $0x54] sm:$0xf0]  ;;  %v540_v36 = vld [vmem:[#allocation3 + $0xd0] sm:$0xf] }
  0x11   :  { %339 = vmatpush.bf16.msrb.mxu0 %v497_v18  ;;  %353 = vmatpush.bf16.msrb.mxu1 %v561_v21  ;;  %v553_v34 = vor.u32 %v593_v31, %v550_v32  ;;  %v592_v37 = vld [vmem:[#allocation3 + $0xd4] sm:$0xf0]  ;;  %v477_v38 = vor.u32 %v576_v35, %v476_v33  ;;  %v575_v39 = vld [vmem:[#allocation3 + $0x54] sm:$0xf]  ;;  %v478_v40 = vld [vmem:[#allocation3 + $0x58] sm:$0xf0] }
  0x12   :  { %312 = vmatpush.bf16.msra.mxu2 %v485_v25  ;;  %v591_v41 = vld [vmem:[#allocation3 + $0xd4] sm:$0xf]  ;;  %326 = vmatpush.bf16.msra.mxu3 %v549_v29  ;;  %v541_v42 = vor.u32 %v592_v37, %v540_v36  ;;  %v481_v43 = vor.u32 %v575_v39, %v478_v40  ;;  %v542_v44 = vld [vmem:[#allocation3 + $0xd8] sm:$0xf0]  ;;  %v468_v45 = vld [vmem:[#allocation3 + $0x40] sm:$0xf] }
  0x13   :  { %v574_v46 = vld [vmem:[#allocation3 + $0x44] sm:$0xf0]  ;;  %v545_v47 = vor.u32 %v591_v41, %v542_v44  ;;  %v532_v48 = vld [vmem:[#allocation3 + $0xc0] sm:$0xf]  ;;  %v573_v50 = vld [vmem:[#allocation3 + $0x44] sm:$0xf] }
  0x14   :  { %v590_v49 = vld [vmem:[#allocation3 + $0xc4] sm:$0xf0]  ;;  %v470_v51 = vld [vmem:[#allocation3 + $0x48] sm:$0xf0]  ;;  %v589_v52 = vld [vmem:[#allocation3 + $0xc4] sm:$0xf]  ;;  %v469_v54 = vor.u32 %v574_v46, %v468_v45 }
  0x15   :  { %340 = vmatpush.bf16.msrb.mxu0 %v489_v30  ;;  %354 = vmatpush.bf16.msrb.mxu1 %v553_v34  ;;  %v534_v53 = vld [vmem:[#allocation3 + $0xc8] sm:$0xf0]  ;;  %v533_v55 = vor.u32 %v590_v49, %v532_v48  ;;  %v473_v56 = vor.u32 %v573_v50, %v470_v51  ;;  %v460_v58 = vld [vmem:[#allocation3 + $0x30] sm:$0xf]  ;;  %v572_v59 = vld [vmem:[#allocation3 + $0x34] sm:$0xf0] }
  0x16   :  { %313 = vmatpush.bf16.msra.mxu2 %v477_v38  ;;  %327 = vmatpush.bf16.msra.mxu3 %v541_v42  ;;  %v537_v57 = vor.u32 %v589_v52, %v534_v53  ;;  %v524_v60 = vld [vmem:[#allocation3 + $0xb0] sm:$0xf]  ;;  %v461_v61 = vor.u32 %v572_v59, %v460_v58  ;;  %v588_v62 = vld [vmem:[#allocation3 + $0xb4] sm:$0xf0]  ;;  %v571_v63 = vld [vmem:[#allocation3 + $0x34] sm:$0xf] }
  0x17   :  { %v462_v0 = vld [vmem:[#allocation3 + $0x38] sm:$0xf0]  ;;  %v525_v1 = vor.u32 %v588_v62, %v524_v60  ;;  %v587_v3 = vld [vmem:[#allocation3 + $0xb4] sm:$0xf]  ;;  %v452_v6 = vld [vmem:[#allocation3 + $0x20] sm:$0xf] }
  0x18   :  { %v465_v2 = vor.u32 %v571_v63, %v462_v0  ;;  %v526_v4 = vld [vmem:[#allocation3 + $0xb8] sm:$0xf0]  ;;  %v570_v7 = vld [vmem:[#allocation3 + $0x24] sm:$0xf0]  ;;  %v516_v9 = vld [vmem:[#allocation3 + $0xa0] sm:$0xf] }
  0x19   :  { %341 = vmatpush.bf16.msrb.mxu0 %v481_v43  ;;  %355 = vmatpush.bf16.msrb.mxu1 %v545_v47  ;;  %v529_v5 = vor.u32 %v587_v3, %v526_v4  ;;  %v453_v8 = vor.u32 %v570_v7, %v452_v6  ;;  %v586_v10 = vld [vmem:[#allocation3 + $0xa4] sm:$0xf0]  ;;  %v569_v11 = vld [vmem:[#allocation3 + $0x24] sm:$0xf]  ;;  %v454_v13 = vld [vmem:[#allocation3 + $0x28] sm:$0xf0] }
  0x1a   :  { %314 = vmatpush.bf16.msra.mxu2 %v469_v54  ;;  %328 = vmatpush.bf16.msra.mxu3 %v533_v55  ;;  %v517_v12 = vor.u32 %v586_v10, %v516_v9  ;;  %v585_v14 = vld [vmem:[#allocation3 + $0xa4] sm:$0xf]  ;;  %v518_v15 = vld [vmem:[#allocation3 + $0xa8] sm:$0xf0]  ;;  %v457_v16 = vor.u32 %v569_v11, %v454_v13  ;;  %v444_v18 = vld [vmem:[#allocation3 + $0x10] sm:$0xf] }
  0x1b   :  { %v521_v17 = vor.u32 %v585_v14, %v518_v15  ;;  %v568_v19 = vld [vmem:[#allocation3 + $0x14] sm:$0xf0]  ;;  %v508_v20 = vld [vmem:[#allocation3 + $0x90] sm:$0xf]  ;;  %v567_v23 = vld [vmem:[#allocation3 + $0x14] sm:$0xf] }
  0x1c   :  { %v445_v21 = vor.u32 %v568_v19, %v444_v18  ;;  %v584_v22 = vld [vmem:[#allocation3 + $0x94] sm:$0xf0]  ;;  %v446_v24 = vld [vmem:[#allocation3 + $0x18] sm:$0xf0]  ;;  %v583_v27 = vld [vmem:[#allocation3 + $0x94] sm:$0xf] }
  0x1d   :  { %342 = vmatpush.bf16.msrb.mxu0 %v473_v56  ;;  %356 = vmatpush.bf16.msrb.mxu1 %v537_v57  ;;  %v509_v25 = vor.u32 %v584_v22, %v508_v20  ;;  %v449_v26 = vor.u32 %v567_v23, %v446_v24  ;;  %v510_v28 = vld [vmem:[#allocation3 + $0x98] sm:$0xf0]  ;;  %v436_v30 = vld [vmem:[#allocation3] sm:$0xf]  ;;  %v566_v31 = vld [vmem:[#allocation3 + $0x4] sm:$0xf0] }
  0x1e   :  { %315 = vmatpush.bf16.msra.mxu2 %v461_v61  ;;  %329 = vmatpush.bf16.msra.mxu3 %v525_v1  ;;  %v513_v29 = vor.u32 %v583_v27, %v510_v28  ;;  %v500_v32 = vld [vmem:[#allocation3 + $0x80] sm:$0xf]  ;;  %v437_v33 = vor.u32 %v566_v31, %v436_v30  ;;  %v582_v34 = vld [vmem:[#allocation3 + $0x84] sm:$0xf0]  ;;  %v565_v35 = vld [vmem:[#allocation3 + $0x4] sm:$0xf] }
  0x1f   :  { %v438_v36 = vld [vmem:[#allocation3 + $0x8] sm:$0xf0]  ;;  %v501_v37 = vor.u32 %v582_v34, %v500_v32  ;;  %v581_v39 = vld [vmem:[#allocation3 + $0x84] sm:$0xf]  ;;  %v49_v42 = vld [vmem:[%s711_s2] sm:$0x3] }
  0x20   :  { %v441_v38 = vor.u32 %v565_v35, %v438_v36  ;;  %v502_v40 = vld [vmem:[#allocation3 + $0x88] sm:$0xf0]  ;;  %v51_v45 = vperm.slane %v49_v42, 0  ;;  %v52_v46 = vperm.slane %v49_v42, 1  ;;  %v371_v59 = vld [vmem:[%s714_s5] sm:$0x3] }
  0x21   :  { %343 = vmatpush.bf16.msrb.mxu0 %v465_v2  ;;  %357 = vmatpush.bf16.msrb.mxu1 %v529_v5  ;;  %v505_v41 = vor.u32 %v581_v39, %v502_v40  ;;  %382 = vst [vmem:[#allocation1] ss:$9 sm:$0xff] %v371_v59  ;;  %v145_v60 = vld [vmem:[%s713_s4] sm:$0x3]  ;;  %v374_v61 = vld [vmem:[#allocation2] sm:$0x1] }
  0x22   :  { %316 = vmatpush.bf16.msra.mxu2 %v453_v8  ;;  %330 = vmatpush.bf16.msra.mxu3 %v517_v12  ;;  %v631_v62 = vmov 0   ;;  %v148_v0 = vperm.slane %v145_v60, 1  ;;  %v147_v4 = vperm.slane %v145_v60, 0  ;;  %vm413_vm2 = vcmask 122880  }
  0x23   :  { %601 = vset.pattern.permute.xlu0 %v631_v62 }
  0x24   :  { %377 = vperm.xlu0 %601, %v374_v61  }
  0x25   :  { %344 = vmatpush.bf16.msrb.mxu0 %v457_v16  ;;  %358 = vmatpush.bf16.msrb.mxu1 %v521_v17 }
  0x26   :  { %317 = vmatpush.bf16.msra.mxu2 %v445_v21  ;;  %331 = vmatpush.bf16.msra.mxu3 %v509_v25 }
  0x28   :  { %v384_v23 = vld [vmem:[#allocation1 + $0x9] sm:$0xff]  ;;  %v383_v24 = vld [vmem:[#allocation1] sm:$0xff] }
  0x29   :  { %345 = vmatpush.bf16.msrb.mxu0 %v449_v26  ;;  %359 = vmatpush.bf16.msrb.mxu1 %v513_v29 }
  0x2a   :  { %318 = vmatpush.bf16.msra.mxu2 %v437_v33  ;;  %332 = vmatpush.bf16.msra.mxu3 %v501_v37 }
  0x2d   :  { %346 = vmatpush.bf16.msrb.mxu0 %v441_v38  ;;  %360 = vmatpush.bf16.msrb.mxu1 %v505_v41 }
  0x8d   :  { %v88_v43 = vpop.f32.mrf.mxu0  ;;  %v102_v44 = vpop.f32.mrf.mxu1 }
  0x8e   :  { %v89_v47 = vadd.f32 %v88_v43, %v51_v45  ;;  %v103_v48 = vadd.f32 %v102_v44, %v52_v46 }
  0x90   :  { %v107_v53 = vmax.f32 %v89_v47, 0.0  ;;  %v108_v55 = vmax.f32 %v103_v48, 0.0 }
  0x95   :  { %v90_v49 = vpop.f32.mrf.mxu0  ;;  %v104_v51 = vpop.f32.mrf.mxu1 }
  0x96   :  { %v91_v50 = vadd.f32 %v90_v49, %v51_v45  ;;  %v105_v52 = vadd.f32 %v104_v51, %v52_v46  ;;  %v378_v26 = vpop.permute.xlu0 %377 }
  0x97   :  { %v380_v27 = vperm.slane %v378_v26, 0 }
  0x98   :  { %v109_v54 = vmax.f32 %v91_v50, 0.0  ;;  %v110_v56 = vmax.f32 %v105_v52, 0.0 }
  0x9a   :  { %v111_v57 = vpack.c.bf16 %v109_v54, %v107_v53  ;;  %v112_v58 = vpack.c.bf16 %v110_v56, %v108_v55 }
  0x9c   :  { %319 = vmatmul.bf16.vlgmr.msra.gmra.mxu2 %v111_v57  ;;  %347 = vmatmul.bf16.vlgmr.msrb.gmra.mxu0 %v111_v57 }
  0x9d   :  { %333 = vmatmul.bf16.vlgmr.msra.gmra.mxu3 %v112_v58  ;;  %361 = vmatmul.bf16.vlgmr.msrb.gmra.mxu1 %v112_v58 }
 0x119   :  { %v348_v63 = vpop.f32.mrf.mxu0 }
 0x11a   :  { %v362_v1 = vpop.f32.mrf.mxu1  ;;  %v349_v2 = vadd.f32 %v348_v63, %v148_v0 }
 0x11c   :  { %v363_v7 = vadd.f32 %v362_v1, %v349_v2 }
 0x11e   :  { %v368_v12 = vmax.f32 %v363_v7, 0.0 }
 0x11f   :  { %v320_v3 = vpop.f32.mrf.mxu2 }
 0x120   :  { %v334_v5 = vpop.f32.mrf.mxu3  ;;  %v321_v10 = vadd.f32 %v320_v3, %v147_v4 }
 0x121   :  { %v350_v6 = vpop.f32.mrf.mxu0 }
 0x122   :  { %v351_v8 = vadd.f32 %v350_v6, %v148_v0  ;;  %v364_v9 = vpop.f32.mrf.mxu1  ;;  %v335_v15 = vadd.f32 %v334_v5, %v321_v10 }
 0x124   :  { %v365_v11 = vadd.f32 %v364_v9, %v351_v8  ;;  %v367_v20 = vmax.f32 %v335_v15, 0.0 }
 0x126   :  { %v370_v13 = vmax.f32 %v365_v11, 0.0 }
 0x127   :  { %v322_v14 = vpop.f32.mrf.mxu2 }
 0x128   :  { %v323_v16 = vadd.f32 %v322_v14, %v147_v4  ;;  %v373_v17 = vpack.c.bf16 %v370_v13, %v368_v12  ;;  %v336_v18 = vpop.f32.mrf.mxu3 }
 0x12a   :  { %v337_v19 = vadd.f32 %v336_v18, %v323_v16  ;;  %407 = vmatpush.bf16.xpose.msrb.mxu3 %v373_v17 }
 0x12c   :  { %v369_v21 = vmax.f32 %v337_v19, 0.0 }
 0x12e   :  { %v372_v22 = vpack.c.bf16 %v369_v21, %v367_v20 }
 0x130   :  { %394 = vmatpush.bf16.xpose.msrb.mxu2 %v372_v22 }
 0x131   :  { %408 = vmatmul.bf16.vlgmr.msrb.gmra.mxu3 %v384_v23 }
 0x137   :  { %395 = vmatmul.bf16.vlgmr.msrb.gmra.mxu2 %v383_v24 }
 0x1b4   :  { %v409_v25 = vpop.f32.mrf.mxu3 }
 0x1ba   :  { %v396_v28 = vpop.f32.mrf.mxu2 }
 0x1bb   :  { %v397_v29 = vadd.f32 %v396_v28, %v380_v27 }
 0x1bc   :  { %v411_v30 = vpop.f32.mrf.mxu3 }
 0x1bd   :  { %v410_v31 = vadd.f32 %v409_v25, %v397_v29 }
 0x1bf   :  { %414 = vst.msk [vmem:[%s716_s7] sm:$0x1] %vm413_vm2, %v410_v31 }
 0x1c2   :  { %v398_v32 = vpop.f32.mrf.mxu2 }
 0x1c3   :  { %419 = vsyncpa [#allocation4], 1 }

</bundles_post_ra>
